<compile_context>
chip_gen: v6e
topology: v6e:2x2x1
jax: 0.10.0
libtpu: 0.0.40
codegen_flags: <defaults>
</compile_context>

<pallas_src>
import jax
import jax.numpy as jnp
from jax import lax
from jax.experimental import pallas as pl
from jax.experimental.pallas import tpu as pltpu


def _round_up(x, m):
    return (x + m - 1) // m * m


def _encoder_kernel(x_ref, wh_ref, bh_ref, emb_ref, out_ref, h_ref):
    # x_ref  : (TM, D)   bf16 embedded input tokens for this row tile
    # wh_ref : (D, D)    bf16 hidden-layer weight (resident, single-buffered)
    # bh_ref : (1, D)    f32  hidden-layer bias   (resident, single-buffered)
    # emb_ref: (TV, D)   bf16 vocab tile of the tied word-embedding matrix
    # out_ref: (TM, TV)  logits tile
    # h_ref  : (TM, D)   bf16 VMEM scratch caching the hidden activations

    # Compute the hidden encoder only once per row tile (first vocab tile);
    # reuse the cached result for every other vocab tile of the same rows.
    @pl.when(pl.program_id(1) == 0)
    def _():
        acc = jnp.dot(x_ref[...], wh_ref[...],
                      preferred_element_type=jnp.float32)
        h = jnp.tanh(acc + bh_ref[...])          # bias + tanh in f32 (v5e-safe)
        h_ref[...] = h.astype(h_ref.dtype)       # single cast to bf16 for MXU

    # Tied output projection: logits = h @ E^T. Contract on the shared D axis
    # directly (no in-kernel transpose / XLU copy).
    out_ref[...] = lax.dot_general(
        h_ref[...], emb_ref[...],
        dimension_numbers=(((1,), (1,)), ((), ())),
        preferred_element_type=jnp.float32,
    ).astype(out_ref.dtype)


def encoder_forward(tokens, word_embed, w_hidden, b_hidden, *,
                    tm=256, tv=512,
                    compute_dtype=jnp.bfloat16, out_dtype=jnp.bfloat16):
    """tokens: [B, S] int32, word_embed: [V, D], w_hidden: [D, D], b_hidden: [D].

    Defaults (tm=256, tv=512, bf16 compute/out, single-buffered resident Wh)
    are a v7x-safe tile plan for D up to ~4K; on v5e/v6e (128 MiB VMEM) tm/tv
    can be raised further by the caller.
    """
    B, S = tokens.shape
    V, D = word_embed.shape
    M = B * S

    bc = jnp.dtype(compute_dtype).itemsize
    bo = jnp.dtype(out_dtype).itemsize

    # ---- tile selection -------------------------------------------------
    tm_eff = max(8, min(tm, _round_up(M, 8)))
    # v7x has 2 TensorCores: keep >= 2 row tiles when there is enough work.
    if M >= 256 and pl.cdiv(M, tm_eff) < 2:
        tm_eff = _round_up(pl.cdiv(M, 2), 8)
    tv_eff = max(128, min(tv, _round_up(V, 128)))

    M_pad = _round_up(M, tm_eff)
    V_pad = _round_up(V, tv_eff)
    grid = (M_pad // tm_eff, V_pad // tv_eff)
    n_row_tiles = grid[0]

    # ---- input layer: embedding gather, directly in the compute dtype ----
    # (avoids materializing an f32 [M, D] activation and separate pad / cast
    #  HBM passes before the kernel).
    emb_c = word_embed.astype(compute_dtype)                 # [V, D] bf16
    x_c = jnp.take(emb_c, tokens.reshape(-1), axis=0)        # [M, D] bf16
    if M_pad != M:
        x_c = jnp.pad(x_c, ((0, M_pad - M), (0, 0)))
    if V_pad != V:
        emb_c = jnp.pad(emb_c, ((0, V_pad - V), (0, 0)))

    wh_c = w_hidden.astype(compute_dtype)
    bh = b_hidden.reshape(1, D).astype(jnp.float32)

    # ---- VMEM budget / limit, per generation ------------------------------
    vmem_need = (2 * tm_eff * D * bc            # x row tiles (double-buffered)
                 + D * D * bc + D * 4           # Wh + bias (resident, 1 buffer)
                 + 2 * tv_eff * D * bc          # embedding vocab tiles
                 + 2 * tm_eff * tv_eff * bo     # logits tiles
                 + tm_eff * D * bc)             # cached hidden-h scratch
    try:
        phys_vmem = int(pltpu.get_tpu_info().vmem_capacity_bytes)
    except Exception:
        phys_vmem = 64 * 1024 * 1024            # conservative: v7x per-TC VMEM
    vmem_limit = max(32 * 1024 * 1024, int(vmem_need * 1.5) + (4 << 20))
    vmem_limit = min(vmem_limit, int(phys_vmem * 0.85))
    # TODO(synk): if D is so large that Wh (D*D) cannot stay resident in VMEM
    # (e.g. D >= ~5K on v7x), add a K-tiling grid axis over D instead.

    cost = pl.CostEstimate(
        flops=int(2 * M_pad * D * D + 2 * M_pad * V_pad * D),
        transcendentals=int(M_pad * D),
        bytes_accessed=int(M_pad * D * bc                      # x read
                           + D * D * bc + D * 4                # Wh + bias
                           + n_row_tiles * V_pad * D * bc      # E re-streams
                           + M_pad * V_pad * bo),              # logits write
    )

    def _run(single_buffer_resident):
        # Constant-index resident operands need only one VMEM buffer.
        kw = ({"pipeline_mode": pl.Buffered(1)}
              if single_buffer_resident else {})
        in_specs = [
            pl.BlockSpec((tm_eff, D), lambda i, j: (i, 0)),        # x row tile
            pl.BlockSpec((D, D), lambda i, j: (0, 0), **kw),       # Wh resident
            pl.BlockSpec((1, D), lambda i, j: (0, 0), **kw),       # bias resident
            pl.BlockSpec((tv_eff, D), lambda i, j: (j, 0)),        # E vocab tile
        ]
        return pl.pallas_call(
            _encoder_kernel,
            out_shape=jax.ShapeDtypeStruct((M_pad, V_pad), out_dtype),
            grid_spec=pltpu.PrefetchScalarGridSpec(
                num_scalar_prefetch=0,
                grid=grid,
                in_specs=in_specs,
                out_specs=pl.BlockSpec((tm_eff, tv_eff), lambda i, j: (i, j)),
                scratch_shapes=[pltpu.VMEM((tm_eff, D), compute_dtype)],
            ),
            compiler_params=pltpu.CompilerParams(
                dimension_semantics=("parallel", "arbitrary"),
                vmem_limit_bytes=vmem_limit,
            ),
            cost_estimate=cost,
        )(x_c, wh_c, bh, emb_c)

    try:
        # Preferred: single-buffered resident Wh / bias (halves their VMEM).
        logits = _run(True)
    except Exception:
        # Fallback for jax versions without Buffered(1) on the TPU pipeliner:
        # identical math, default double-buffered resident weights.
        logits = _run(False)

    return logits[:M, :V].reshape(B, S, V)


def _reference(tokens, word_embed, w_hidden, b_hidden):
    x = jnp.take(word_embed, tokens.reshape(-1), axis=0)
    h = jnp.tanh(x @ w_hidden + b_hidden[None, :])
    logits = h @ word_embed.T
    B, S = tokens.shape
    return logits.reshape(B, S, -1)


if __name__ == "__main__":
    # Small shapes consistent with the module: batch=2, seq=8, hidden D=32,
    # vocab V=256. (Tiles are clamped down to the problem size inside the
    # wrapper; at real sizes they default to tm=256 / tv=512.)
    B, S, D, V = 2, 8, 32, 256

    key = jax.random.PRNGKey(0)
    k_emb, k_wh, k_bh, k_tok = jax.random.split(key, 4)

    word_embed = jax.random.normal(k_emb, (V, D), dtype=jnp.float32) * 0.1
    w_hidden = jax.random.normal(k_wh, (D, D), dtype=jnp.float32) * 0.1
    b_hidden = jax.random.normal(k_bh, (D,), dtype=jnp.float32) * 0.1
    tokens = jax.random.randint(k_tok, (B, S), 0, V, dtype=jnp.int32)

    out = encoder_forward(tokens, word_embed, w_hidden, b_hidden)
    out = jax.block_until_ready(out)

    ref = _reference(tokens, word_embed, w_hidden, b_hidden)
    assert out.shape == (B, S, V)
    # bf16 MXU operands + bf16 logits with f32 accumulation: loosened tolerance
    # vs the f32 reference.
    assert jnp.allclose(out.astype(jnp.float32), ref, atol=2.5e-2, rtol=2.5e-2)

    print("KERNEL_OK")
</pallas_src>

<mosaic_0001>
module attributes {stable_mosaic.version = 11 : i64} {
  func.func @_encoder_kernel(%arg0: i32, %arg1: i32, %arg2: memref<16x32xbf16, #tpu.memory_space<vmem>>, %arg3: memref<32x32xbf16, #tpu.memory_space<vmem>>, %arg4: memref<1x32xf32, #tpu.memory_space<vmem>>, %arg5: memref<256x32xbf16, #tpu.memory_space<vmem>>, %arg6: memref<16x256xbf16, #tpu.memory_space<vmem>>, %arg7: memref<16x32xbf16, #tpu.memory_space<vmem>>) attributes {dimension_semantics = [#tpu.dimension_semantics<parallel>, #tpu.dimension_semantics<arbitrary>], iteration_bounds = array<i64: 1, 1>, scalar_prefetch = 0 : i64, scratch_operands = 1 : i64, tpu.core_type = #tpu.core_type<tc>, window_params = [{transform_indices = @transform_0, window_bounds = array<i64: 16, 32>}, {pipeline_mode = #tpu.pipeline_mode<synchronous>, transform_indices = @transform_1, window_bounds = array<i64: 32, 32>}, {pipeline_mode = #tpu.pipeline_mode<synchronous>, transform_indices = @transform_2, window_bounds = array<i64: 1, 32>}, {transform_indices = @transform_3, window_bounds = array<i64: 256, 32>}, {transform_indices = @transform_4, window_bounds = array<i64: 16, 256>}]} {
    %c0_i32 = arith.constant 0 : i32
    %0 = arith.cmpi eq, %arg1, %c0_i32 : i32
    %1 = arith.extui %0 : i1 to i32
    %c0_i32_0 = arith.constant 0 : i32
    %2 = arith.cmpi ne, %1, %c0_i32_0 : i32
    scf.if %2 {
      %c0_6 = arith.constant 0 : index
      %c0_7 = arith.constant 0 : index
      %8 = vector.load %arg2[%c0_6, %c0_7] : memref<16x32xbf16, #tpu.memory_space<vmem>>, vector<16x32xbf16>
      %c0_8 = arith.constant 0 : index
      %c0_9 = arith.constant 0 : index
      %9 = vector.load %arg3[%c0_8, %c0_9] : memref<32x32xbf16, #tpu.memory_space<vmem>>, vector<32x32xbf16>
      %cst_10 = arith.constant dense<0.000000e+00> : vector<16x32xf32>
      %10 = tpu.matmul %8, %9, %cst_10 {dimension_numbers = #tpu.dot_dimension_numbers<[1], [0], [0], [1], [0, 0, 1, 1], [], []>} : vector<16x32xbf16>, vector<32x32xbf16>, vector<16x32xf32> -> vector<16x32xf32>
      %c0_11 = arith.constant 0 : index
      %c0_12 = arith.constant 0 : index
      %11 = vector.load %arg4[%c0_11, %c0_12] : memref<1x32xf32, #tpu.memory_space<vmem>>, vector<1x32xf32>
      %12 = vector.broadcast %11 : vector<1x32xf32> to vector<16x32xf32>
      %13 = arith.addf %10, %12 : vector<16x32xf32>
      %14 = math.tanh %13 : vector<16x32xf32>
      %15 = arith.truncf %14 : vector<16x32xf32> to vector<16x32xbf16>
      %c0_13 = arith.constant 0 : index
      %c0_14 = arith.constant 0 : index
      %16 = vector.load %arg7[%c0_13, %c0_14] : memref<16x32xbf16, #tpu.memory_space<vmem>>, vector<16x32xbf16>
      tpu.vector_store %arg7[%c0_13, %c0_14], %15 {strides = array<i32>} : memref<16x32xbf16, #tpu.memory_space<vmem>>, vector<16x32xbf16>,
    } else {
    }
    %c0 = arith.constant 0 : index
    %c0_1 = arith.constant 0 : index
    %3 = vector.load %arg7[%c0, %c0_1] : memref<16x32xbf16, #tpu.memory_space<vmem>>, vector<16x32xbf16>
    %c0_2 = arith.constant 0 : index
    %c0_3 = arith.constant 0 : index
    %4 = vector.load %arg5[%c0_2, %c0_3] : memref<256x32xbf16, #tpu.memory_space<vmem>>, vector<256x32xbf16>
    %cst = arith.constant dense<0.000000e+00> : vector<16x256xf32>
    %5 = tpu.matmul %3, %4, %cst {dimension_numbers = #tpu.dot_dimension_numbers<[1], [1], [0], [0], [0, 0, 1, 0], [], []>} : vector<16x32xbf16>, vector<256x32xbf16>, vector<16x256xf32> -> vector<16x256xf32>
    %6 = arith.truncf %5 : vector<16x256xf32> to vector<16x256xbf16>
    %c0_4 = arith.constant 0 : index
    %c0_5 = arith.constant 0 : index
    %7 = vector.load %arg6[%c0_4, %c0_5] : memref<16x256xbf16, #tpu.memory_space<vmem>>, vector<16x256xbf16>
    tpu.vector_store %arg6[%c0_4, %c0_5], %6 {strides = array<i32>} : memref<16x256xbf16, #tpu.memory_space<vmem>>, vector<16x256xbf16>,
    return
  }
  func.func @transform_0(%arg0: i32, %arg1: i32) -> (i32, i32) {
    %c0_i32 = arith.constant 0 : i32
    %c0_i32_0 = arith.constant 0 : i32
    return %arg0, %c0_i32 : i32, i32
  }
  func.func @transform_1(%arg0: i32, %arg1: i32) -> (i32, i32) {
    %c0_i32 = arith.constant 0 : i32
    %c0_i32_0 = arith.constant 0 : i32
    %c0_i32_1 = arith.constant 0 : i32
    return %c0_i32, %c0_i32_0 : i32, i32
  }
  func.func @transform_2(%arg0: i32, %arg1: i32) -> (i32, i32) {
    %c0_i32 = arith.constant 0 : i32
    %c0_i32_0 = arith.constant 0 : i32
    %c0_i32_1 = arith.constant 0 : i32
    return %c0_i32, %c0_i32_0 : i32, i32
  }
  func.func @transform_3(%arg0: i32, %arg1: i32) -> (i32, i32) {
    %c0_i32 = arith.constant 0 : i32
    %c0_i32_0 = arith.constant 0 : i32
    return %arg1, %c0_i32 : i32, i32
  }
  func.func @transform_4(%arg0: i32, %arg1: i32) -> (i32, i32) {
    %c0_i32 = arith.constant 0 : i32
    return %arg0, %arg1 : i32, i32
  }
}

module attributes {stable_mosaic.version = 11 : i64} {
  func.func @_encoder_kernel(%arg0: i32, %arg1: i32, %arg2: memref<16x32xbf16, #tpu.memory_space<vmem>>, %arg3: memref<32x32xbf16, #tpu.memory_space<vmem>>, %arg4: memref<1x32xf32, #tpu.memory_space<vmem>>, %arg5: memref<256x32xbf16, #tpu.memory_space<vmem>>, %arg6: memref<16x256xbf16, #tpu.memory_space<vmem>>, %arg7: memref<16x32xbf16, #tpu.memory_space<vmem>>) attributes {dimension_semantics = [#tpu.dimension_semantics<parallel>, #tpu.dimension_semantics<arbitrary>], iteration_bounds = array<i64: 1, 1>, scalar_prefetch = 0 : i64, scratch_operands = 1 : i64, tpu.core_type = #tpu.core_type<tc>, window_params = [{transform_indices = @transform_0, window_bounds = array<i64: 16, 32>}, {pipeline_mode = #tpu.pipeline_mode<synchronous>, transform_indices = @transform_1, window_bounds = array<i64: 32, 32>}, {pipeline_mode = #tpu.pipeline_mode<synchronous>, transform_indices = @transform_2, window_bounds = array<i64: 1, 32>}, {transform_indices = @transform_3, window_bounds = array<i64: 256, 32>}, {transform_indices = @transform_4, window_bounds = array<i64: 16, 256>}]} {
    %c0_i32 = arith.constant 0 : i32
    %0 = arith.cmpi eq, %arg1, %c0_i32 : i32
    %1 = arith.extui %0 : i1 to i32
    %c0_i32_0 = arith.constant 0 : i32
    %2 = arith.cmpi ne, %1, %c0_i32_0 : i32
    scf.if %2 {
      %c0_6 = arith.constant 0 : index
      %c0_7 = arith.constant 0 : index
      %8 = vector.load %arg2[%c0_6, %c0_7] : memref<16x32xbf16, #tpu.memory_space<vmem>>, vector<16x32xbf16>
      %c0_8 = arith.constant 0 : index
      %c0_9 = arith.constant 0 : index
      %9 = vector.load %arg3[%c0_8, %c0_9] : memref<32x32xbf16, #tpu.memory_space<vmem>>, vector<32x32xbf16>
      %cst_10 = arith.constant dense<0.000000e+00> : vector<16x32xf32>
      %10 = tpu.matmul %8, %9, %cst_10 {dimension_numbers = #tpu.dot_dimension_numbers<[1], [0], [0], [1], [0, 0, 1, 1], [], []>} : vector<16x32xbf16>, vector<32x32xbf16>, vector<16x32xf32> -> vector<16x32xf32>
      %c0_11 = arith.constant 0 : index
      %c0_12 = arith.constant 0 : index
      %11 = vector.load %arg4[%c0_11, %c0_12] : memref<1x32xf32, #tpu.memory_space<vmem>>, vector<1x32xf32>
      %12 = vector.broadcast %11 : vector<1x32xf32> to vector<16x32xf32>
      %13 = arith.addf %10, %12 : vector<16x32xf32>
      %14 = math.tanh %13 : vector<16x32xf32>
      %15 = arith.truncf %14 : vector<16x32xf32> to vector<16x32xbf16>
      %c0_13 = arith.constant 0 : index
      %c0_14 = arith.constant 0 : index
      %16 = vector.load %arg7[%c0_13, %c0_14] : memref<16x32xbf16, #tpu.memory_space<vmem>>, vector<16x32xbf16>
      tpu.vector_store %arg7[%c0_13, %c0_14], %15 {strides = array<i32>} : memref<16x32xbf16, #tpu.memory_space<vmem>>, vector<16x32xbf16>,
    } else {
    }
    %c0 = arith.constant 0 : index
    %c0_1 = arith.constant 0 : index
    %3 = vector.load %arg7[%c0, %c0_1] : memref<16x32xbf16, #tpu.memory_space<vmem>>, vector<16x32xbf16>
    %c0_2 = arith.constant 0 : index
    %c0_3 = arith.constant 0 : index
    %4 = vector.load %arg5[%c0_2, %c0_3] : memref<256x32xbf16, #tpu.memory_space<vmem>>, vector<256x32xbf16>
    %cst = arith.constant dense<0.000000e+00> : vector<16x256xf32>
    %5 = tpu.matmul %3, %4, %cst {dimension_numbers = #tpu.dot_dimension_numbers<[1], [1], [0], [0], [0, 0, 1, 0], [], []>} : vector<16x32xbf16>, vector<256x32xbf16>, vector<16x256xf32> -> vector<16x256xf32>
    %6 = arith.truncf %5 : vector<16x256xf32> to vector<16x256xbf16>
    %c0_4 = arith.constant 0 : index
    %c0_5 = arith.constant 0 : index
    %7 = vector.load %arg6[%c0_4, %c0_5] : memref<16x256xbf16, #tpu.memory_space<vmem>>, vector<16x256xbf16>
    tpu.vector_store %arg6[%c0_4, %c0_5], %6 {strides = array<i32>} : memref<16x256xbf16, #tpu.memory_space<vmem>>, vector<16x256xbf16>,
    return
  }
  func.func @transform_0(%arg0: i32, %arg1: i32) -> (i32, i32) {
    %c0_i32 = arith.constant 0 : i32
    %c0_i32_0 = arith.constant 0 : i32
    return %arg0, %c0_i32 : i32, i32
  }
  func.func @transform_1(%arg0: i32, %arg1: i32) -> (i32, i32) {
    %c0_i32 = arith.constant 0 : i32
    %c0_i32_0 = arith.constant 0 : i32
    %c0_i32_1 = arith.constant 0 : i32
    return %c0_i32, %c0_i32_0 : i32, i32
  }
  func.func @transform_2(%arg0: i32, %arg1: i32) -> (i32, i32) {
    %c0_i32 = arith.constant 0 : i32
    %c0_i32_0 = arith.constant 0 : i32
    %c0_i32_1 = arith.constant 0 : i32
    return %c0_i32, %c0_i32_0 : i32, i32
  }
  func.func @transform_3(%arg0: i32, %arg1: i32) -> (i32, i32) {
    %c0_i32 = arith.constant 0 : i32
    %c0_i32_0 = arith.constant 0 : i32
    return %arg1, %c0_i32 : i32, i32
  }
  func.func @transform_4(%arg0: i32, %arg1: i32) -> (i32, i32) {
    %c0_i32 = arith.constant 0 : i32
    return %arg0, %arg1 : i32, i32
  }
}

</mosaic_0001>

<bundles_post_ra>
// kernel: tpu_custom_call.1
= control target key start
LH: loop header
LB: loop body
LE: loop exit
PB: predicated region body
PF: predicated region fallthrough
CT: control target
= control target key end

     0   :  { %v474_v1 = vmov 0.0   ;;  %vm475_vm0 = vmmov 0   ;;  %vm53_vm1 = vcmask 261120   ;;  %s586_s0 = inlined_call_operand.vmem [shape: bf16[16,32], index: 0, kind: input, shape index: {}]   ;;  %s587_s1 = inlined_call_operand.vmem [shape: bf16[32,32], index: 1, kind: input, shape index: {}]   ;;  %s588_s2 = inlined_call_operand.vmem [shape: f32[1,32], index: 2, kind: input, shape index: {}]   ;;  %s589_s3 = inlined_call_operand.vmem [shape: bf16[256,32], index: 3, kind: input, shape index: {}]   ;;  %s590_s4 = inlined_call_operand.hbm [shape: bf16[16,256], index: 4, kind: output, shape index: {}]  }
   0x1   :  { %v428_v0 = vld [vmem:[%s587_s1 + $0x8] sm:$0xff]   ;;  %407 = vmatprep.subr.bf16.mxu0 %v474_v1  ;;  %v429_v2 = vld [vmem:[%s587_s1] sm:$0xff]   ;;  %411 = vmatprep.mubr.msk.bf16.mxu0 %vm475_vm0, %v474_v1  ;;  %v431_v4 = vld [vmem:[%s589_s3 + $0x78] sm:$0xff]  }
   0x2   :  { %408 = vmatpush3.bf16.msra.mxu0 %v428_v0  ;;  %v430_v3 = vld [vmem:[%s586_s0] sm:$0xff]   ;;  %v432_v5 = vld [vmem:[%s589_s3 + $0x38] sm:$0xff]   ;;  %415 = vmatprep.subr.msk.bf16.mxu1 %vm53_vm1, %v431_v4  ;;  %v433_v6 = vld [vmem:[%s589_s3 + $0x70] sm:$0xff]  }
   0x3   :  { %409 = vmatprep.subr.bf16.mxu0 %v474_v1  ;;  %v256_v7 = vsel %vm53_vm1, %v432_v5, 0  ;;  %v434_v8 = vld [vmem:[%s589_s3 + $0x30] sm:$0xff]   ;;  %v435_v10 = vld [vmem:[%s589_s3 + $0x68] sm:$0xff]  }
   0x4   :  { %390 = vmatpush3.bf16.xpose.msra.mxu1 %v256_v7  ;;  %v253_v9 = vsel %vm53_vm1, %v434_v8, 0  ;;  %v436_v11 = vld [vmem:[%s589_s3 + $0x28] sm:$0xff]  }
   0x5   :  { %416 = vmatprep.subr.msk.bf16.mxu1 %vm53_vm1, %v433_v6 }
   0x6   :  { %410 = vmatpush3.bf16.msra.mxu0 %v429_v2 }
   0x9   :  { %412 = vmatmul.mubr.msk.bf16.vlgmr.msra.gmra.mxu0 %vm53_vm1, %v430_v3 }
   0xc   :  { %392 = vmatpush3.bf16.xpose.msra.mxu1 %v253_v9 }
   0xd   :  { %417 = vmatprep.subr.msk.bf16.mxu1 %vm53_vm1, %v435_v10 }
   0xe   :  { %9 = vsyncpa [#allocation4], 0  ;;  %v250_v12 = vsel %vm53_vm1, %v436_v11, 0  ;;  %v437_v13 = vld [vmem:[%s589_s3 + $0x60] sm:$0xff]   ;;  %v439_v16 = vld [vmem:[%s589_s3 + $0x58] sm:$0xff]   ;;  %vm108_vm2 = vcmask 257024  }
   0xf   :  { %v438_v14 = vld [vmem:[%s589_s3 + $0x20] sm:$0xff]   ;;  %v440_v17 = vld [vmem:[%s589_s3 + $0x18] sm:$0xff]   ;;  %v441_v19 = vld [vmem:[%s589_s3 + $0x50] sm:$0xff]  }
  0x10   :  { %v247_v15 = vsel %vm53_vm1, %v438_v14, 0  ;;  %v244_v18 = vsel %vm53_vm1, %v440_v17, 0  ;;  %v442_v20 = vld [vmem:[%s589_s3 + $0x10] sm:$0xff]   ;;  %v443_v22 = vld [vmem:[%s589_s3 + $0x48] sm:$0xff]   ;;  %v445_v25 = vld [vmem:[%s589_s3 + $0x40] sm:$0xff]  }
  0x11   :  { %v241_v21 = vsel %vm53_vm1, %v442_v20, 0  ;;  %v444_v23 = vld [vmem:[%s589_s3 + $0x8] sm:$0xff]   ;;  %v446_v26 = vld [vmem:[%s589_s3] sm:$0xff]  }
  0x12   :  { %v238_v24 = vsel %vm53_vm1, %v444_v23, 0  ;;  %v235_v27 = vsel %vm53_vm1, %v446_v26, 0  ;;  %v355_v28 = vld [vmem:[%s588_s2] ss:$0 sm:$0xff]  ;;  %s476_s2 = smov [#allocation3]  }
  0x13   :  { %s344_s3 = sshll.u32 %s476_s2, 4  ;;  %s345_s3 = int_to_ptr.vmem [resolvable:$true] %s344_s3 }
  0x14   :  { %394 = vmatpush3.bf16.xpose.msra.mxu1 %v250_v12  ;;  %s452_s0 = scalar_lea.vmem %s345_s3, 256  ;;  %p457_p1 = scmp.lt.s32.totalorder %s345_s3, %s345_s3 }
  0x15   :  { %418 = vmatprep.subr.msk.bf16.mxu1 %vm53_vm1, %v437_v13  ;;  %p453_p0 = scmp.ne.s32.totalorder %s345_s3, %s452_s0  ;;  %p458_p2 = scmp.lt.s32.totalorder %s452_s0, %s452_s0 }
  0x17   :  { %p459_p3 = por %p458_p2, %p457_p1 }
  0x19   :  { %p460_p4 = pnand %p459_p3, %p453_p0 }
  0x1c   :  { %396 = vmatpush3.bf16.xpose.msra.mxu1 %v247_v15 }
  0x1d   :  { %419 = vmatprep.subr.msk.bf16.mxu1 %vm53_vm1, %v439_v16 }
  0x24   :  { %398 = vmatpush3.bf16.xpose.msra.mxu1 %v244_v18 }
  0x25   :  { %420 = vmatprep.subr.msk.bf16.mxu1 %vm53_vm1, %v441_v19 }
  0x2c   :  { %400 = vmatpush3.bf16.xpose.msra.mxu1 %v241_v21 }
  0x2d   :  { %421 = vmatprep.subr.msk.bf16.mxu1 %vm53_vm1, %v443_v22 }
  0x34   :  { %402 = vmatpush3.bf16.xpose.msra.mxu1 %v238_v24 }
  0x35   :  { %422 = vmatprep.subr.msk.bf16.mxu1 %vm53_vm1, %v445_v25 }
  0x3c   :  { %404 = vmatpush3.bf16.xpose.msra.mxu1 %v235_v27 }
  0xc9   :  { %v91_v29 = vpop.f32.mrf.mxu0 }
  0xca   :  { %v92_v30 = vadd.f32 %v355_v28, %v91_v29 }
  0xcb   :  { %v413_v31 = vpop.f32.mrf.mxu0 }
  0xcc   :  { %448 = vtanh.f32 %v92_v30 }
  0xcd   :  { %v94_v32 = vpop.f32.mrf.mxu0 }
  0xce   :  { %v95_v33 = vadd.f32 %v355_v28, %v94_v32 }
  0xcf   :  { %v414_v34 = vpop.f32.mrf.mxu0 }
  0xd0   :  { %450 = vtanh.f32 %v95_v33 }
  0xd9   :  { %v449_v35 = vpop.eup %448 }
  0xda   :  { %v382_v36 = vpack.c.bf16 %v449_v35, %v449_v35 }
  0xdc   :  { %109 = vst.msk [vmem:[#allocation2] sm:$0xf] %vm108_vm2, %v382_v36 }
  0xdd   :  { %v451_v37 = vpop.eup %450 }
  0xde   :  { %v383_v38 = vpack.c.bf16 %v451_v37, %v451_v37 }
  0xe0   :  { %110 = vst.msk [vmem:[#allocation2 + $0x4] sm:$0xf] %vm108_vm2, %v383_v38 }
  0xe7   :  { %v447_v39 = vld [vmem:[#allocation2] sm:$0xff]  }
  0xe8   :  { %405 = vmatprep.mubr.msk.bf16.mxu1 %vm53_vm1, %v447_v39 }
  0xe9   :  { %406 = vmatmul.mubr.msk.bf16.vlgmr.msra.gmra.mxu1 %vm53_vm1, %v447_v39 }
 0x1a9   :  { %v316_v40 = vpop.f32.mrf.mxu1 }
 0x1ab   :  { %v318_v41 = vpop.f32.mrf.mxu1 }
 0x1ac   :  { %v384_v42 = vpack.c.bf16 %v318_v41, %v316_v40 }
 0x1ad   :  { %v320_v43 = vpop.f32.mrf.mxu1 }
 0x1ae   :  { %337 = vst [vmem:[#allocation3] sm:$0xff] %v384_v42 }
 0x1af   :  { %v322_v44 = vpop.f32.mrf.mxu1 }
 0x1b0   :  { %v385_v45 = vpack.c.bf16 %v322_v44, %v320_v43 }
 0x1b2   :  { %338 = vst [vmem:[#allocation3 + $0x8] sm:$0xff] %v385_v45 }
 0x1b3   :  { %463 = shalt.err (!%p460_p4)
}
 0x1b4   :  { %s477_s26 = smov 128   ;;  %s478_s27 = smov 8  }
 0x1b5   :  { %350 = dma.vmem_to_hbm [thread:$0]  %s345_s3, 256, %s590_s4, [#allocation4], %s477_s26, %s477_s26, %s478_s27  }
 0x1b6   :  { %472 = dma.done.wait [#allocation4], 256  }
 0x1b7   :  { %473 = vsyncadd [#allocation4], 4294967040 }
 0x1b8   :  { %354 = vsyncpa [#allocation4], 1 }

// kernel: tpu_custom_call.1
= control target key start
LH: loop header
LB: loop body
LE: loop exit
PB: predicated region body
PF: predicated region fallthrough
CT: control target
= control target key end

     0   :  { %v474_v1 = vmov 0.0   ;;  %vm475_vm0 = vmmov 0   ;;  %vm53_vm1 = vcmask 261120   ;;  %s586_s0 = inlined_call_operand.vmem [shape: bf16[16,32], index: 0, kind: input, shape index: {}]   ;;  %s587_s1 = inlined_call_operand.vmem [shape: bf16[32,32], index: 1, kind: input, shape index: {}]   ;;  %s588_s2 = inlined_call_operand.vmem [shape: f32[1,32], index: 2, kind: input, shape index: {}]   ;;  %s589_s3 = inlined_call_operand.vmem [shape: bf16[256,32], index: 3, kind: input, shape index: {}]   ;;  %s590_s4 = inlined_call_operand.hbm [shape: bf16[16,256], index: 4, kind: output, shape index: {}]  }
   0x1   :  { %v428_v0 = vld [vmem:[%s587_s1 + $0x8] sm:$0xff]   ;;  %407 = vmatprep.subr.bf16.mxu0 %v474_v1  ;;  %v429_v2 = vld [vmem:[%s587_s1] sm:$0xff]   ;;  %411 = vmatprep.mubr.msk.bf16.mxu0 %vm475_vm0, %v474_v1  ;;  %v431_v4 = vld [vmem:[%s589_s3 + $0x78] sm:$0xff]  }
   0x2   :  { %408 = vmatpush3.bf16.msra.mxu0 %v428_v0  ;;  %v430_v3 = vld [vmem:[%s586_s0] sm:$0xff]   ;;  %v432_v5 = vld [vmem:[%s589_s3 + $0x38] sm:$0xff]   ;;  %415 = vmatprep.subr.msk.bf16.mxu1 %vm53_vm1, %v431_v4  ;;  %v433_v6 = vld [vmem:[%s589_s3 + $0x70] sm:$0xff]  }
   0x3   :  { %409 = vmatprep.subr.bf16.mxu0 %v474_v1  ;;  %v256_v7 = vsel %vm53_vm1, %v432_v5, 0  ;;  %v434_v8 = vld [vmem:[%s589_s3 + $0x30] sm:$0xff]   ;;  %v435_v10 = vld [vmem:[%s589_s3 + $0x68] sm:$0xff]  }
   0x4   :  { %390 = vmatpush3.bf16.xpose.msra.mxu1 %v256_v7  ;;  %v253_v9 = vsel %vm53_vm1, %v434_v8, 0  ;;  %v436_v11 = vld [vmem:[%s589_s3 + $0x28] sm:$0xff]  }
   0x5   :  { %416 = vmatprep.subr.msk.bf16.mxu1 %vm53_vm1, %v433_v6 }
   0x6   :  { %410 = vmatpush3.bf16.msra.mxu0 %v429_v2 }
   0x9   :  { %412 = vmatmul.mubr.msk.bf16.vlgmr.msra.gmra.mxu0 %vm53_vm1, %v430_v3 }
   0xc   :  { %392 = vmatpush3.bf16.xpose.msra.mxu1 %v253_v9 }
   0xd   :  { %417 = vmatprep.subr.msk.bf16.mxu1 %vm53_vm1, %v435_v10 }
   0xe   :  { %9 = vsyncpa [#allocation4], 0  ;;  %v250_v12 = vsel %vm53_vm1, %v436_v11, 0  ;;  %v437_v13 = vld [vmem:[%s589_s3 + $0x60] sm:$0xff]   ;;  %v439_v16 = vld [vmem:[%s589_s3 + $0x58] sm:$0xff]   ;;  %vm108_vm2 = vcmask 257024  }
   0xf   :  { %v438_v14 = vld [vmem:[%s589_s3 + $0x20] sm:$0xff]   ;;  %v440_v17 = vld [vmem:[%s589_s3 + $0x18] sm:$0xff]   ;;  %v441_v19 = vld [vmem:[%s589_s3 + $0x50] sm:$0xff]  }
  0x10   :  { %v247_v15 = vsel %vm53_vm1, %v438_v14, 0  ;;  %v244_v18 = vsel %vm53_vm1, %v440_v17, 0  ;;  %v442_v20 = vld [vmem:[%s589_s3 + $0x10] sm:$0xff]   ;;  %v443_v22 = vld [vmem:[%s589_s3 + $0x48] sm:$0xff]   ;;  %v445_v25 = vld [vmem:[%s589_s3 + $0x40] sm:$0xff]  }
  0x11   :  { %v241_v21 = vsel %vm53_vm1, %v442_v20, 0  ;;  %v444_v23 = vld [vmem:[%s589_s3 + $0x8] sm:$0xff]   ;;  %v446_v26 = vld [vmem:[%s589_s3] sm:$0xff]  }
  0x12   :  { %v238_v24 = vsel %vm53_vm1, %v444_v23, 0  ;;  %v235_v27 = vsel %vm53_vm1, %v446_v26, 0  ;;  %v355_v28 = vld [vmem:[%s588_s2] ss:$0 sm:$0xff]  ;;  %s476_s2 = smov [#allocation3]  }
  0x13   :  { %s344_s3 = sshll.u32 %s476_s2, 4  ;;  %s345_s3 = int_to_ptr.vmem [resolvable:$true] %s344_s3 }
  0x14   :  { %394 = vmatpush3.bf16.xpose.msra.mxu1 %v250_v12  ;;  %s452_s0 = scalar_lea.vmem %s345_s3, 256  ;;  %p457_p1 = scmp.lt.s32.totalorder %s345_s3, %s345_s3 }
  0x15   :  { %418 = vmatprep.subr.msk.bf16.mxu1 %vm53_vm1, %v437_v13  ;;  %p453_p0 = scmp.ne.s32.totalorder %s345_s3, %s452_s0  ;;  %p458_p2 = scmp.lt.s32.totalorder %s452_s0, %s452_s0 }
  0x17   :  { %p459_p3 = por %p458_p2, %p457_p1 }
  0x19   :  { %p460_p4 = pnand %p459_p3, %p453_p0 }
  0x1c   :  { %396 = vmatpush3.bf16.xpose.msra.mxu1 %v247_v15 }
  0x1d   :  { %419 = vmatprep.subr.msk.bf16.mxu1 %vm53_vm1, %v439_v16 }
  0x24   :  { %398 = vmatpush3.bf16.xpose.msra.mxu1 %v244_v18 }
  0x25   :  { %420 = vmatprep.subr.msk.bf16.mxu1 %vm53_vm1, %v441_v19 }
  0x2c   :  { %400 = vmatpush3.bf16.xpose.msra.mxu1 %v241_v21 }
  0x2d   :  { %421 = vmatprep.subr.msk.bf16.mxu1 %vm53_vm1, %v443_v22 }
  0x34   :  { %402 = vmatpush3.bf16.xpose.msra.mxu1 %v238_v24 }
  0x35   :  { %422 = vmatprep.subr.msk.bf16.mxu1 %vm53_vm1, %v445_v25 }
  0x3c   :  { %404 = vmatpush3.bf16.xpose.msra.mxu1 %v235_v27 }
  0xc9   :  { %v91_v29 = vpop.f32.mrf.mxu0 }
  0xca   :  { %v92_v30 = vadd.f32 %v355_v28, %v91_v29 }
  0xcb   :  { %v413_v31 = vpop.f32.mrf.mxu0 }
  0xcc   :  { %448 = vtanh.f32 %v92_v30 }
  0xcd   :  { %v94_v32 = vpop.f32.mrf.mxu0 }
  0xce   :  { %v95_v33 = vadd.f32 %v355_v28, %v94_v32 }
  0xcf   :  { %v414_v34 = vpop.f32.mrf.mxu0 }
  0xd0   :  { %450 = vtanh.f32 %v95_v33 }
  0xd9   :  { %v449_v35 = vpop.eup %448 }
  0xda   :  { %v382_v36 = vpack.c.bf16 %v449_v35, %v449_v35 }
  0xdc   :  { %109 = vst.msk [vmem:[#allocation2] sm:$0xf] %vm108_vm2, %v382_v36 }
  0xdd   :  { %v451_v37 = vpop.eup %450 }
  0xde   :  { %v383_v38 = vpack.c.bf16 %v451_v37, %v451_v37 }
  0xe0   :  { %110 = vst.msk [vmem:[#allocation2 + $0x4] sm:$0xf] %vm108_vm2, %v383_v38 }
  0xe7   :  { %v447_v39 = vld [vmem:[#allocation2] sm:$0xff]  }
  0xe8   :  { %405 = vmatprep.mubr.msk.bf16.mxu1 %vm53_vm1, %v447_v39 }
  0xe9   :  { %406 = vmatmul.mubr.msk.bf16.vlgmr.msra.gmra.mxu1 %vm53_vm1, %v447_v39 }
 0x1a9   :  { %v316_v40 = vpop.f32.mrf.mxu1 }
 0x1ab   :  { %v318_v41 = vpop.f32.mrf.mxu1 }
 0x1ac   :  { %v384_v42 = vpack.c.bf16 %v318_v41, %v316_v40 }
 0x1ad   :  { %v320_v43 = vpop.f32.mrf.mxu1 }
 0x1ae   :  { %337 = vst [vmem:[#allocation3] sm:$0xff] %v384_v42 }
 0x1af   :  { %v322_v44 = vpop.f32.mrf.mxu1 }
 0x1b0   :  { %v385_v45 = vpack.c.bf16 %v322_v44, %v320_v43 }
 0x1b2   :  { %338 = vst [vmem:[#allocation3 + $0x8] sm:$0xff] %v385_v45 }
 0x1b3   :  { %463 = shalt.err (!%p460_p4)
}
 0x1b4   :  { %s477_s26 = smov 128   ;;  %s478_s27 = smov 8  }
 0x1b5   :  { %350 = dma.vmem_to_hbm [thread:$0]  %s345_s3, 256, %s590_s4, [#allocation4], %s477_s26, %s477_s26, %s478_s27  }
 0x1b6   :  { %472 = dma.done.wait [#allocation4], 256  }
 0x1b7   :  { %473 = vsyncadd [#allocation4], 4294967040 }
 0x1b8   :  { %354 = vsyncpa [#allocation4], 1 }

</bundles_post_ra>
